<compile_context>
chip_gen: v6e
topology: v6e:2x2x1
jax: 0.10.0
libtpu: 0.0.40
codegen_flags: <defaults>
</compile_context>

<pallas_src>
import jax
import jax.numpy as jnp
from jax.experimental import pallas as pl
from jax.experimental.pallas import tpu as pltpu


def _head_kernel(cls_ref, w_ref, b_ref, out_ref):
    """One batch tile of the regression head: out = cls @ w + b.

    cls_ref : (TB, H)        f32   -- CLS rows for this batch tile
    w_ref   : (H, OUT_PAD)   bf16  -- constant index map, resident across steps
    b_ref   : (1, OUT_PAD)   f32   -- constant index map, resident
    out_ref : (TB, OUT_PAD)  f32   -- lane-dense output block
    """
    # Dropout(p=0.2) is identity in eval mode (PyTorch nn.Dropout eval behavior).
    # TODO(synk): train-mode dropout would use pltpu.prng_seed/prng_random_bits
    # plus 1/(1-p) scaling; forward-eval semantics need no op here.

    # Cast f32 HBM rows to bf16 right at the MXU feed; accumulate in f32.
    x = cls_ref[...].astype(w_ref.dtype)
    y = jnp.dot(x, w_ref[...], preferred_element_type=jnp.float32)
    out_ref[...] = (y + b_ref[...]).astype(out_ref.dtype)


def roberta_regression_head(last_hidden_state, w, b, *, block_b=None,
                            compute_dtype=jnp.bfloat16):
    """last_hidden_state: [B, S, H]; w: [H, OUT]; b: [OUT]  ->  [B, OUT] f32."""
    B, S, H = last_hidden_state.shape
    H_w, OUT = w.shape
    assert H_w == H

    # Lane-dense padded output width (multiple of 128 lanes).
    OUT_PAD = max(128, ((OUT + 127) // 128) * 128)

    # CLS-token selection + (eval) dropout happen here. NOTE: deliberately no
    # dtype cast — the kernel casts per-tile so the rows are read from HBM
    # exactly once, in their native f32.
    cls = last_hidden_state[:, 0, :]

    # Tiny parameters: pad to 128 output lanes; weight in bf16 (~H*256 bytes),
    # bias kept f32 so the epilogue add stays f32 (v5e VPU has no bf16).
    w_pad = jnp.zeros((H, OUT_PAD), dtype=compute_dtype)
    w_pad = w_pad.at[:, :OUT].set(w.astype(compute_dtype))
    b_pad = jnp.zeros((1, OUT_PAD), dtype=jnp.float32)
    b_pad = b_pad.at[:, :OUT].set(b.astype(jnp.float32))

    # Batch tile: prefer a single grid step; otherwise the fewest even,
    # 8-aligned steps under a conservative double-buffer budget (12 MiB keeps
    # headroom under v5e's 16 MiB scoped-VMEM default; v6e/v7x have more).
    in_itemsize = jnp.dtype(cls.dtype).itemsize
    if block_b is None:
        budget = 12 * 1024 * 1024
        max_tb = max(8, ((budget // (2 * H * in_itemsize)) // 8) * 8)
        if B <= max_tb:
            tb = B
        else:
            n_steps = pl.cdiv(B, max_tb)          # >= 2 steps: feeds both v7x TCs
            tb = min(max_tb, ((pl.cdiv(B, n_steps) + 7) // 8) * 8)
    else:
        tb = min(block_b, B)
        if tb < B:
            tb = max(8, (tb // 8) * 8)
        tb = min(tb, B)
    grid = (pl.cdiv(B, tb),)

    cost = pl.CostEstimate(
        flops=2 * B * H * OUT_PAD,
        transcendentals=0,
        bytes_accessed=(B * H * in_itemsize                       # CLS rows (f32)
                        + H * OUT_PAD * jnp.dtype(compute_dtype).itemsize
                        + OUT_PAD * 4                              # bias
                        + B * OUT_PAD * 4),                        # output
    )

    out_padded = pl.pallas_call(
        _head_kernel,
        out_shape=jax.ShapeDtypeStruct((B, OUT_PAD), jnp.float32),
        grid_spec=pltpu.PrefetchScalarGridSpec(
            num_scalar_prefetch=0,
            grid=grid,
            in_specs=[
                # CLS rows: batch-tiled, double-buffered over the grid.
                pl.BlockSpec((tb, H), lambda i: (i, 0)),
                # Weight: constant index map -> DMA'd once, stays resident.
                pl.BlockSpec((H, OUT_PAD), lambda i: (0, 0)),
                # Bias: constant index map, one (1, 128) f32 VMEM tile.
                pl.BlockSpec((1, OUT_PAD), lambda i: (0, 0)),
            ],
            out_specs=pl.BlockSpec((tb, OUT_PAD), lambda i: (i, 0)),
        ),
        compiler_params=pltpu.CompilerParams(
            dimension_semantics=("parallel",)),
        cost_estimate=cost,
    )(cls, w_pad, b_pad)

    return out_padded[:, :OUT]


def synth_backbone(input_ids, attention_mask, emb_table):
    """Deterministic stand-in for the pretrained RoBERTa encoder.

    # TODO(synk): the real `cardiffnlp/twitter-roberta-base` transformer
    # backbone is a checkpoint load with no clean in-script Pallas equivalent;
    # we synthesize last_hidden_state with a masked embedding lookup so the
    # head kernel sees realistic shapes/dtypes.
    """
    hid = emb_table[input_ids]                                  # [B, S, H]
    hid = hid * attention_mask[..., None].astype(hid.dtype)     # mask padding
    return hid


if __name__ == "__main__":
    # Small shapes consistent with the module's forward. (Perf tuning should
    # use the production H=768; H=32 here is correctness-only.)
    B, S, H, VOCAB, OUT = 16, 8, 32, 64, 3

    key = jax.random.PRNGKey(0)
    k_ids, k_emb, k_w, k_b = jax.random.split(key, 4)

    input_ids = jax.random.randint(k_ids, (B, S), 0, VOCAB, dtype=jnp.int32)
    attention_mask = jnp.ones((B, S), dtype=jnp.int32)

    # Deterministic parameter init (shapes from __init__: Linear(hidden, 3)).
    emb_table = jax.random.normal(k_emb, (VOCAB, H), dtype=jnp.float32) * 0.02
    w = jax.random.normal(k_w, (H, OUT), dtype=jnp.float32) * 0.02   # [H, 3]
    b = jax.random.normal(k_b, (OUT,), dtype=jnp.float32) * 0.02     # [3]

    # "roberta(...)" stand-in (plain JAX glue).
    last_hidden_state = synth_backbone(input_ids, attention_mask, emb_table)

    # Default path: single grid step (launch/DMA overhead minimized).
    out = roberta_regression_head(last_hidden_state, w, b)
    out = jax.block_until_ready(out)

    # Tiled path: block_b=8 -> 2-step "parallel" batch grid, exercising the
    # pipelined batch axis and resident weight/bias specs.
    out_tiled = roberta_regression_head(last_hidden_state, w, b, block_b=8)
    out_tiled = jax.block_until_ready(out_tiled)

    # Reference checks in plain JAX.
    cls = last_hidden_state[:, 0, :]
    ref_bf16 = jnp.dot(cls.astype(jnp.bfloat16), w.astype(jnp.bfloat16),
                       preferred_element_type=jnp.float32) + b
    ref_f32 = cls @ w + b

    assert out.shape == (B, OUT)
    assert out_tiled.shape == (B, OUT)
    assert jnp.allclose(out, ref_bf16, atol=1e-5, rtol=1e-4), (out, ref_bf16)
    # bf16 MXU inputs vs f32 nn.Linear: deliberate precision tradeoff.
    assert jnp.allclose(out, ref_f32, atol=5e-3, rtol=5e-2), (out, ref_f32)
    assert jnp.allclose(out_tiled, out, atol=1e-6), (out_tiled, out)

    print("KERNEL_OK")
</pallas_src>

<mosaic_0001>
module attributes {stable_mosaic.version = 11 : i64} {
  func.func @_head_kernel(%arg0: i32, %arg1: memref<16x32xf32, #tpu.memory_space<vmem>>, %arg2: memref<32x128xbf16, #tpu.memory_space<vmem>>, %arg3: memref<1x128xf32, #tpu.memory_space<vmem>>, %arg4: memref<16x128xf32, #tpu.memory_space<vmem>>) attributes {dimension_semantics = [#tpu.dimension_semantics<parallel>], iteration_bounds = array<i64: 1>, scalar_prefetch = 0 : i64, scratch_operands = 0 : i64, tpu.core_type = #tpu.core_type<tc>, window_params = [{transform_indices = @transform_0, window_bounds = array<i64: 16, 32>}, {pipeline_mode = #tpu.pipeline_mode<synchronous>, transform_indices = @transform_1, window_bounds = array<i64: 32, 128>}, {pipeline_mode = #tpu.pipeline_mode<synchronous>, transform_indices = @transform_2, window_bounds = array<i64: 1, 128>}, {transform_indices = @transform_3, window_bounds = array<i64: 16, 128>}]} {
    %c0 = arith.constant 0 : index
    %c0_0 = arith.constant 0 : index
    %0 = vector.load %arg1[%c0, %c0_0] : memref<16x32xf32, #tpu.memory_space<vmem>>, vector<16x32xf32>
    %1 = arith.truncf %0 : vector<16x32xf32> to vector<16x32xbf16>
    %c0_1 = arith.constant 0 : index
    %c0_2 = arith.constant 0 : index
    %2 = vector.load %arg2[%c0_1, %c0_2] : memref<32x128xbf16, #tpu.memory_space<vmem>>, vector<32x128xbf16>
    %cst = arith.constant dense<0.000000e+00> : vector<16x128xf32>
    %3 = tpu.matmul %1, %2, %cst {dimension_numbers = #tpu.dot_dimension_numbers<[1], [0], [0], [1], [0, 0, 1, 1], [], []>} : vector<16x32xbf16>, vector<32x128xbf16>, vector<16x128xf32> -> vector<16x128xf32>
    %c0_3 = arith.constant 0 : index
    %c0_4 = arith.constant 0 : index
    %4 = vector.load %arg3[%c0_3, %c0_4] : memref<1x128xf32, #tpu.memory_space<vmem>>, vector<1x128xf32>
    %5 = vector.broadcast %4 : vector<1x128xf32> to vector<16x128xf32>
    %6 = arith.addf %3, %5 : vector<16x128xf32>
    %c0_5 = arith.constant 0 : index
    %c0_6 = arith.constant 0 : index
    %7 = vector.load %arg4[%c0_5, %c0_6] : memref<16x128xf32, #tpu.memory_space<vmem>>, vector<16x128xf32>
    tpu.vector_store %arg4[%c0_5, %c0_6], %6 {strides = array<i32>} : memref<16x128xf32, #tpu.memory_space<vmem>>, vector<16x128xf32>,
    return
  }
  func.func @transform_0(%arg0: i32) -> (i32, i32) {
    %c0_i32 = arith.constant 0 : i32
    %c0_i32_0 = arith.constant 0 : i32
    return %arg0, %c0_i32 : i32, i32
  }
  func.func @transform_1(%arg0: i32) -> (i32, i32) {
    %c0_i32 = arith.constant 0 : i32
    %c0_i32_0 = arith.constant 0 : i32
    %c0_i32_1 = arith.constant 0 : i32
    return %c0_i32, %c0_i32_0 : i32, i32
  }
  func.func @transform_2(%arg0: i32) -> (i32, i32) {
    %c0_i32 = arith.constant 0 : i32
    %c0_i32_0 = arith.constant 0 : i32
    %c0_i32_1 = arith.constant 0 : i32
    return %c0_i32, %c0_i32_0 : i32, i32
  }
  func.func @transform_3(%arg0: i32) -> (i32, i32) {
    %c0_i32 = arith.constant 0 : i32
    %c0_i32_0 = arith.constant 0 : i32
    return %arg0, %c0_i32 : i32, i32
  }
}

</mosaic_0001>

<bundles_post_ra>
// kernel: tpu_custom_call.1
= control target key start
LH: loop header
LB: loop body
LE: loop exit
PB: predicated region body
PF: predicated region fallthrough
CT: control target
= control target key end

     0   :  { %8 = vsyncpa [#allocation3], 0  ;;  %s274_s0 = inlined_call_operand.hbm [shape: f32[16,32], index: 0, kind: input, shape index: {}]   ;;  %s275_s1 = inlined_call_operand.hbm [shape: bf16[32,128], index: 1, kind: input, shape index: {}]   ;;  %s276_s2 = inlined_call_operand.vmem [shape: f32[1,128], index: 2, kind: input, shape index: {}]   ;;  %s277_s3 = inlined_call_operand.hbm [shape: f32[16,128], index: 3, kind: output, shape index: {}]  }
   0x1   :  { %9 = vsyncpa [#allocation6], 0 }
   0x2   :  { %10 = vsyncpa [#allocation4], 0  ;;  %s227_s12 = smov [#allocation2]  }
   0x3   :  { %s16_s13 = sshll.u32 %s227_s12, 4  ;;  %s17_s13 = int_to_ptr.vmem [resolvable:$true] %s16_s13 }
   0x4   :  { %s169_s14 = scalar_lea.vmem %s17_s13, 256  ;;  %p174_p1 = scmp.lt.s32.totalorder %s17_s13, %s17_s13 }
   0x5   :  { %p170_p0 = scmp.ne.s32.totalorder %s17_s13, %s169_s14  ;;  %p175_p2 = scmp.lt.s32.totalorder %s169_s14, %s169_s14 }
   0x7   :  { %p176_p3 = por %p175_p2, %p174_p1 }
   0x9   :  { %p177_p4 = pnand %p176_p3, %p170_p0 }
   0xb   :  { %180 = shalt.err (!%p177_p4)
}
   0xc   :  { %s228_s15 = smov 128   ;;  %s229_s16 = smov 8  }
   0xd   :  { %22 = dma.hbm_to_vmem [thread:$0]  %s274_s0, 256, %s17_s13, [#allocation3], %s228_s15, %s228_s15, %s229_s16  }
   0xe   :  { %s230_s19 = smov [#allocation5]  }
   0xf   :  { %s28_s20 = sshll.u32 %s230_s19, 4  ;;  %s29_s20 = int_to_ptr.vmem [resolvable:$true] %s28_s20 }
  0x10   :  { %s189_s21 = scalar_lea.vmem %s29_s20, 256  ;;  %p194_p6 = scmp.lt.s32.totalorder %s29_s20, %s29_s20 }
  0x11   :  { %p190_p5 = scmp.ne.s32.totalorder %s29_s20, %s189_s21  ;;  %p195_p7 = scmp.lt.s32.totalorder %s189_s21, %s189_s21 }
  0x13   :  { %p196_p8 = por %p195_p7, %p194_p6 }
  0x15   :  { %p197_p9 = pnand %p196_p8, %p190_p5 }
  0x17   :  { %200 = shalt.err (!%p197_p9)
}
  0x18   :  { %s231_s22 = smov 64   ;;  %s232_s23 = smov 4  }
  0x19   :  { %34 = dma.hbm_to_vmem [thread:$0]  %s275_s1, 256, %s29_s20, [#allocation6], %s231_s22, %s231_s22, %s232_s23  }
  0x1a   :  { %221 = dma.done.wait [#allocation3], 256  }
  0x1b   :  { %222 = vsyncadd [#allocation3], 4294967040 }
  0x1c   :  { %223 = dma.done.wait [#allocation6], 256  }
  0x1d   :  { %224 = vsyncadd [#allocation6], 4294967040  ;;  %v233_v0 = vmov 0.0   ;;  %vm234_vm0 = vmmov 0   ;;  %v159_v1 = vld [vmem:[#allocation5 + $0x8] sm:$0xff]   ;;  %v160_v2 = vld [vmem:[#allocation5] sm:$0xff]  }
  0x1e   :  { %142 = vmatprep.subr.bf16.mxu0 %v233_v0  ;;  %146 = vmatprep.mubr.msk.bf16.mxu0 %vm234_vm0, %v233_v0  ;;  %v44_v3 = vld [vmem:[#allocation2] sm:$0xff]  ;;  %v45_v4 = vld [vmem:[#allocation2 + $0x8] sm:$0xff]  ;;  %vm70_vm1 = vcmask 261120   ;;  %s235_s26 = smov [#allocation7]  }
  0x1f   :  { %143 = vmatpush3.bf16.msra.mxu0 %v159_v1  ;;  %v46_v5 = vpack.c.bf16 %v45_v4, %v44_v3  ;;  %v135_v6 = vld [vmem:[%s276_s2] ss:$0 sm:$0xff]  ;;  %s122_s27 = sshll.u32 %s235_s26, 4  ;;  %s123_s27 = int_to_ptr.vmem [resolvable:$true] %s122_s27 }
  0x20   :  { %144 = vmatprep.subr.bf16.mxu0 %v233_v0  ;;  %s201_s28 = scalar_lea.vmem %s123_s27, 256  ;;  %p206_p11 = scmp.lt.s32.totalorder %s123_s27, %s123_s27 }
  0x21   :  { %p202_p10 = scmp.ne.s32.totalorder %s123_s27, %s201_s28  ;;  %p207_p12 = scmp.lt.s32.totalorder %s201_s28, %s201_s28 }
  0x23   :  { %145 = vmatpush3.bf16.msra.mxu0 %v160_v2  ;;  %p208_p13 = por %p207_p12, %p206_p11 }
  0x25   :  { %p209_p0 = pnand %p208_p13, %p202_p10 }
  0x26   :  { %147 = vmatmul.mubr.msk.bf16.vlgmr.msra.gmra.mxu0 %vm70_vm1, %v46_v5 }
  0xe6   :  { %v108_v7 = vpop.f32.mrf.mxu0 }
  0xe7   :  { %v109_v8 = vadd.f32 %v135_v6, %v108_v7 }
  0xe8   :  { %v148_v9 = vpop.f32.mrf.mxu0 }
  0xe9   :  { %115 = vst [vmem:[#allocation7] sm:$0xff] %v109_v8 }
  0xea   :  { %v111_v10 = vpop.f32.mrf.mxu0 }
  0xeb   :  { %v112_v11 = vadd.f32 %v135_v6, %v111_v10 }
  0xec   :  { %v149_v12 = vpop.f32.mrf.mxu0 }
  0xed   :  { %116 = vst [vmem:[#allocation7 + $0x8] sm:$0xff] %v112_v11 }
  0xee   :  { %212 = shalt.err (!%p209_p0)
}
  0xef   :  { %128 = dma.vmem_to_hbm [thread:$0]  %s123_s27, 256, %s277_s3, [#allocation4], %s228_s15, %s228_s15, %s229_s16  }
  0xf0   :  { %225 = dma.done.wait [#allocation4], 256  }
  0xf1   :  { %226 = vsyncadd [#allocation4], 4294967040 }
  0xf2   :  { %132 = vsyncpa [#allocation3], 1 }
  0xf3   :  { %133 = vsyncpa [#allocation6], 1 }
  0xf4   :  { %134 = vsyncpa [#allocation4], 1 }

</bundles_post_ra>
